<compile_context>
chip_gen: v7x
topology: tpu7x:2x2x1
jax: 0.10.0
libtpu: 0.0.40
codegen_flags: <defaults>
</compile_context>

<pallas_src>
import jax
import jax.numpy as jnp
from jax.experimental import pallas as pl
from jax.experimental.pallas import tpu as pltpu


def sine_activation_kernel(tau_ref, wt_ref, b_ref, mask_ref, out_ref):
    tau = tau_ref[...]        # (TILE, Kw)
    wt = wt_ref[...]          # (Kw, Fw)  resident across grid steps (constant block)
    b = b_ref[...]            # (1, Fw)
    mask = mask_ref[...]      # (1, Fw)   1.0 on sine columns, 0.0 on linear columns

    k = tau.shape[1]
    if k <= 8:
        # Degenerate-K "matmul": unrolled VPU broadcast-FMAs (skips MXU latency).
        y = tau[:, 0:1] * wt[0:1, :] + b
        for kk in range(1, k):
            y = y + tau[:, kk:kk + 1] * wt[kk:kk + 1, :]
    else:
        # MXU is otherwise idle in this mem-bound kernel; use it for the packed path.
        y = jnp.dot(tau, wt, preferred_element_type=jnp.float32) + b

    s = jnp.sin(y)
    out_ref[...] = jnp.where(mask > 0.5, s, y).astype(out_ref.dtype)


def make_fused_params(w, b, w0, b0, *, lane_pack=True):
    """One-time parameter prep (call at init, not per forward).

    Returns (wt, bias, mask, pack).  If pack > 1, the weights are block-diagonal
    so that `pack` consecutive tau rows are processed as one lane-dense
    (pack * out_features == 128 wide) kernel row.
    """
    wt = jnp.concatenate([w, w0], axis=0).T.astype(jnp.float32)    # (K, F)
    bias = jnp.concatenate([b, b0], axis=0).T.astype(jnp.float32)  # (1, F)
    k_in, f_out = wt.shape
    mask = (jnp.arange(f_out) < f_out - 1).astype(jnp.float32)[None, :]  # (1, F)

    pack = 1
    if lane_pack and f_out <= 128 and 128 % f_out == 0:
        pack = 128 // f_out
    if pack > 1:
        # wt_p[g*K + k, h*F + f] = (g == h) * wt[k, f]
        eye = jnp.eye(pack, dtype=jnp.float32)
        wt = jnp.einsum("gh,kf->gkhf", eye, wt).reshape(pack * k_in, pack * f_out)
        bias = jnp.tile(bias, (1, pack))
        mask = jnp.tile(mask, (1, pack))
    return wt, bias, mask, pack


def _round_up(x, m):
    return ((x + m - 1) // m) * m


def sine_activation(tau, params, *, tile_rows=1024):
    """tau: (N, in_features). Returns (N, out_features) float32."""
    wt, bias, mask, pack = params
    n, k_in = tau.shape
    kw, fw = wt.shape
    assert kw == pack * k_in
    f_out = fw // pack

    # Rows the kernel sees after folding `pack` logical rows into one lane-dense row.
    rows = -(-n // pack)
    tile = _round_up(min(int(tile_rows), _round_up(rows, 8)), 8)
    padded_rows = _round_up(rows, tile)
    padded_n = padded_rows * pack
    if padded_n != n:
        tau = jnp.pad(tau, ((0, padded_n - n), (0, 0)))
    # Row-major reshape: tau_p[r, g*K + k] == tau[pack*r + g, k]  (pure view order).
    tau_p = tau.reshape(padded_rows, kw)

    out = pl.pallas_call(
        sine_activation_kernel,
        out_shape=jax.ShapeDtypeStruct((padded_rows, fw), jnp.float32),
        grid_spec=pltpu.PrefetchScalarGridSpec(
            num_scalar_prefetch=0,
            grid=(padded_rows // tile,),
            in_specs=[
                pl.BlockSpec((tile, kw), lambda i: (i, 0)),
                pl.BlockSpec((kw, fw), lambda i: (0, 0)),
                pl.BlockSpec((1, fw), lambda i: (0, 0)),
                pl.BlockSpec((1, fw), lambda i: (0, 0)),
            ],
            out_specs=pl.BlockSpec((tile, fw), lambda i: (i, 0)),
        ),
        compiler_params=pltpu.CompilerParams(
            dimension_semantics=("parallel",),
        ),
    )(tau_p, wt, bias, mask)

    # Row-major reshape back: out_p[r, g*F + j] == out[pack*r + g, j].
    return out.reshape(padded_n, f_out)[:n]


def _reference(tau, w, b, w0, b0):
    # Pure JAX mirror of the PyTorch t2v.
    v1 = jnp.sin(jnp.matmul(w, tau.T) + b)
    v2 = jnp.matmul(w0, tau.T) + b0
    return jnp.concatenate([v1, v2], axis=0).T


if __name__ == "__main__":
    key = jax.random.PRNGKey(0)
    (k_tau, k_w0, k_b0, k_w, k_b,
     k_tau2, k_w2, k_b2, k_tau3) = jax.random.split(key, 9)

    # --- Config A: in_features=4, out_features=32 (lane-packed path, pack=4) ---
    in_features, out_features = 4, 32
    w0 = jax.random.normal(k_w0, (1, in_features), dtype=jnp.float32)
    b0 = jax.random.normal(k_b0, (1, 1), dtype=jnp.float32)
    w = jax.random.normal(k_w, (out_features - 1, in_features), dtype=jnp.float32)
    b = jax.random.normal(k_b, (out_features - 1, 1), dtype=jnp.float32)
    params = make_fused_params(w, b, w0, b0)

    # Case 1: tiny N (single sub-tile block).
    tau1 = jax.random.normal(k_tau, (8, in_features), dtype=jnp.float32)
    out1 = jax.block_until_ready(sine_activation(tau1, params))
    ref1 = _reference(tau1, w, b, w0, b0)
    assert out1.shape == (8, out_features)
    assert jnp.allclose(out1, ref1, atol=1e-4, rtol=1e-4)

    # Case 2: multi-tile grid with a ragged remainder (exercises padding path).
    tau2 = jax.random.normal(k_tau2, (300, in_features), dtype=jnp.float32)
    out2 = jax.block_until_ready(sine_activation(tau2, params, tile_rows=64))
    ref2 = _reference(tau2, w, b, w0, b0)
    assert out2.shape == (300, out_features)
    assert jnp.allclose(out2, ref2, atol=1e-4, rtol=1e-4)

    # --- Config B: out_features=48 (does not divide 128 -> unpacked fallback) ---
    out_features_b = 48
    w_b = jax.random.normal(k_w2, (out_features_b - 1, in_features), dtype=jnp.float32)
    b_b = jax.random.normal(k_b2, (out_features_b - 1, 1), dtype=jnp.float32)
    params_b = make_fused_params(w_b, b_b, w0, b0)
    tau3 = jax.random.normal(k_tau3, (40, in_features), dtype=jnp.float32)
    out3 = jax.block_until_ready(sine_activation(tau3, params_b, tile_rows=32))
    ref3 = _reference(tau3, w_b, b_b, w0, b0)
    assert out3.shape == (40, out_features_b)
    assert jnp.allclose(out3, ref3, atol=1e-4, rtol=1e-4)

    print("KERNEL_OK")
</pallas_src>

<mosaic_0001>
module attributes {stable_mosaic.version = 11 : i64} {
  func.func @sine_activation_kernel(%arg0: i32, %arg1: memref<8x16xf32, #tpu.memory_space<vmem>>, %arg2: memref<16x128xf32, #tpu.memory_space<vmem>>, %arg3: memref<1x128xf32, #tpu.memory_space<vmem>>, %arg4: memref<1x128xf32, #tpu.memory_space<vmem>>, %arg5: memref<8x128xf32, #tpu.memory_space<vmem>>) attributes {dimension_semantics = [#tpu.dimension_semantics<parallel>], iteration_bounds = array<i64: 1>, scalar_prefetch = 0 : i64, scratch_operands = 0 : i64, tpu.core_type = #tpu.core_type<tc>, window_params = [{transform_indices = @transform_0, window_bounds = array<i64: 8, 16>}, {pipeline_mode = #tpu.pipeline_mode<synchronous>, transform_indices = @transform_1, window_bounds = array<i64: 16, 128>}, {pipeline_mode = #tpu.pipeline_mode<synchronous>, transform_indices = @transform_2, window_bounds = array<i64: 1, 128>}, {pipeline_mode = #tpu.pipeline_mode<synchronous>, transform_indices = @transform_3, window_bounds = array<i64: 1, 128>}, {transform_indices = @transform_4, window_bounds = array<i64: 8, 128>}]} {
    %c0 = arith.constant 0 : index
    %c0_0 = arith.constant 0 : index
    %0 = vector.load %arg1[%c0, %c0_0] : memref<8x16xf32, #tpu.memory_space<vmem>>, vector<8x16xf32>
    %c0_1 = arith.constant 0 : index
    %c0_2 = arith.constant 0 : index
    %1 = vector.load %arg2[%c0_1, %c0_2] : memref<16x128xf32, #tpu.memory_space<vmem>>, vector<16x128xf32>
    %c0_3 = arith.constant 0 : index
    %c0_4 = arith.constant 0 : index
    %2 = vector.load %arg3[%c0_3, %c0_4] : memref<1x128xf32, #tpu.memory_space<vmem>>, vector<1x128xf32>
    %c0_5 = arith.constant 0 : index
    %c0_6 = arith.constant 0 : index
    %3 = vector.load %arg4[%c0_5, %c0_6] : memref<1x128xf32, #tpu.memory_space<vmem>>, vector<1x128xf32>
    %cst = arith.constant dense<0.000000e+00> : vector<8x128xf32>
    %4 = tpu.matmul %0, %1, %cst {dimension_numbers = #tpu.dot_dimension_numbers<[1], [0], [0], [1], [0, 0, 1, 1], [], []>} : vector<8x16xf32>, vector<16x128xf32>, vector<8x128xf32> -> vector<8x128xf32>
    %5 = vector.broadcast %2 : vector<1x128xf32> to vector<8x128xf32>
    %6 = arith.addf %4, %5 : vector<8x128xf32>
    %7 = math.sin %6 : vector<8x128xf32>
    %cst_7 = arith.constant 5.000000e-01 : f32
    %8 = vector.broadcast %cst_7 : f32 to vector<1x128xf32>
    %9 = arith.cmpf ogt, %3, %8 : vector<1x128xf32>
    %10 = vector.shape_cast %9 : vector<1x128xi1> to vector<1x128xi1>
    %11 = vector.broadcast %10 : vector<1x128xi1> to vector<8x128xi1>
    %12 = arith.select %11, %7, %6 : vector<8x128xi1>, vector<8x128xf32>
    %c0_8 = arith.constant 0 : index
    %c0_9 = arith.constant 0 : index
    %13 = vector.load %arg5[%c0_8, %c0_9] : memref<8x128xf32, #tpu.memory_space<vmem>>, vector<8x128xf32>
    tpu.vector_store %arg5[%c0_8, %c0_9], %12 {strides = array<i32>} : memref<8x128xf32, #tpu.memory_space<vmem>>, vector<8x128xf32>,
    return
  }
  func.func @transform_0(%arg0: i32) -> (i32, i32) {
    %c0_i32 = arith.constant 0 : i32
    %c0_i32_0 = arith.constant 0 : i32
    return %arg0, %c0_i32 : i32, i32
  }
  func.func @transform_1(%arg0: i32) -> (i32, i32) {
    %c0_i32 = arith.constant 0 : i32
    %c0_i32_0 = arith.constant 0 : i32
    %c0_i32_1 = arith.constant 0 : i32
    return %c0_i32, %c0_i32_0 : i32, i32
  }
  func.func @transform_2(%arg0: i32) -> (i32, i32) {
    %c0_i32 = arith.constant 0 : i32
    %c0_i32_0 = arith.constant 0 : i32
    %c0_i32_1 = arith.constant 0 : i32
    return %c0_i32, %c0_i32_0 : i32, i32
  }
  func.func @transform_3(%arg0: i32) -> (i32, i32) {
    %c0_i32 = arith.constant 0 : i32
    %c0_i32_0 = arith.constant 0 : i32
    %c0_i32_1 = arith.constant 0 : i32
    return %c0_i32, %c0_i32_0 : i32, i32
  }
  func.func @transform_4(%arg0: i32) -> (i32, i32) {
    %c0_i32 = arith.constant 0 : i32
    %c0_i32_0 = arith.constant 0 : i32
    return %arg0, %c0_i32 : i32, i32
  }
}

</mosaic_0001>

<bundles_post_ra>
// kernel: tpu_custom_call.1
= control target key start
LH: loop header
LB: loop body
LE: loop exit
PB: predicated region body
PF: predicated region fallthrough
CT: control target
= control target key end

     0   :  { %9 = vsyncpa [#allocation3], 0  ;;  %s483_s0 = inlined_call_operand.hbm [shape: f32[8,16], index: 0, kind: input, shape index: {}]   ;;  %s484_s1 = inlined_call_operand.hbm [shape: f32[16,128], index: 1, kind: input, shape index: {}]   ;;  %s485_s2 = inlined_call_operand.vmem [shape: f32[1,128], index: 2, kind: input, shape index: {}]   ;;  %s486_s3 = inlined_call_operand.vmem [shape: f32[1,128], index: 3, kind: input, shape index: {}]   ;;  %s487_s4 = inlined_call_operand.hbm [shape: f32[8,128], index: 4, kind: output, shape index: {}]  }
   0x1   :  { %10 = vsyncpa [#allocation6], 0 }
   0x2   :  { %11 = vsyncpa [#allocation4], 0  ;;  %s372_s15 = smov [#allocation2]   ;;  %s373_s17 = smov [#allocation5]  }
   0x3   :  { %s18_s16 = sshll.u32 %s372_s15, 4  ;;  %s27_s18 = sshll.u32 %s373_s17, 4  ;;  %s19_s16 = int_to_ptr.vmem [resolvable:$true] %s18_s16  ;;  %s412_s18 = int_to_ptr.vmem [resolvable:$true] %s27_s18 }
   0x4   :  { %s300_s21 = scalar_lea.hbm %s483_s0, 128 }
   0x5   :  { %p301_p0 = scmp.ne.s32.totalorder %s483_s0, %s300_s21  ;;  %p304_p1 = scmp.lt.u32.totalorder %s300_s21, %s483_s0 }
   0x7   :  { %p306_p2 = pnand %p304_p1, %p301_p0 }
   0x9   :  { %309 = shalt.err (!%p306_p2)
}
   0xa   :  { %s310_s26 = scalar_lea.vmem %s19_s16, 128  ;;  %p315_p4 = scmp.lt.s32.totalorder %s19_s16, %s19_s16 }
   0xb   :  { %p311_p3 = scmp.ne.s32.totalorder %s19_s16, %s310_s26  ;;  %p316_p5 = scmp.lt.s32.totalorder %s310_s26, %s310_s26 }
   0xd   :  { %p317_p6 = por %p316_p5, %p315_p4 }
   0xf   :  { %p318_p7 = pnand %p317_p6, %p311_p3 }
  0x11   :  { %321 = shalt.err (!%p318_p7)
}
  0x12   :  { %21 = dma.hbm_to_vmem [thread:$0]  %s483_s0, 128, %s19_s16, [#allocation3]  }
  0x13   :  { %s322_s5 = scalar_lea.hbm %s484_s1, 256 }
  0x14   :  { %p323_p8 = scmp.ne.s32.totalorder %s484_s1, %s322_s5  ;;  %p326_p9 = scmp.lt.u32.totalorder %s322_s5, %s484_s1 }
  0x16   :  { %p328_p10 = pnand %p326_p9, %p323_p8 }
  0x18   :  { %331 = shalt.err (!%p328_p10)
}
  0x19   :  { %s332_s10 = scalar_lea.vmem %s412_s18, 256  ;;  %p337_p12 = scmp.lt.s32.totalorder %s412_s18, %s412_s18 }
  0x1a   :  { %p333_p11 = scmp.ne.s32.totalorder %s412_s18, %s332_s10  ;;  %p338_p13 = scmp.lt.s32.totalorder %s332_s10, %s332_s10 }
  0x1c   :  { %p339_p0 = por %p338_p13, %p337_p12 }
  0x1e   :  { %p340_p1 = pnand %p339_p0, %p333_p11 }
  0x20   :  { %343 = shalt.err (!%p340_p1)
}
  0x21   :  { %s374_s0 = smov 128   ;;  %s375_s11 = smov 8  }
  0x22   :  { %33 = dma.hbm_to_vmem [thread:$0]  %s484_s1, 256, %s412_s18, [#allocation6], %s374_s0, %s374_s0, %s375_s11  }
  0x23   :  { %366 = dma.done.wait [#allocation3], 128  }
  0x24   :  { %367 = vsyncadd [#allocation3], 4294967168 }
  0x25   :  { %368 = dma.done.wait [#allocation6], 256  }
  0x26   :  { %369 = vsyncadd [#allocation6], 4294967040  ;;  %v376_v0 = vmov 0.0|0.0   ;;  %vm377_vm0 = vmmov 0   ;;  %v378_v1 = vmov 0.0   ;;  %v45_v2 = vld [vmem:[#allocation5] sm:$0xff] }
  0x27   :  { %274 = vmatprep.subr.bf16.mxu0 %v376_v0  ;;  %271 = vmatprep.mubr.msk.f32.mxu0 %vm377_vm0, %v378_v1  ;;  %v46_v3 = vld [vmem:[#allocation5 + $0x8] sm:$0xff]  ;;  %v44_v5 = vld [vmem:[#allocation2] sm:$0xff]  ;;  %vm55_vm1 = vcmask 130048   ;;  %v379_v21 = vmov 2102212464   ;;  %s386_s16 = smov [#allocation7]  }
  0x28   :  { %v275_v4 = vpack.c.bf16 %v46_v3, %v45_v2  ;;  %v258_v6 = vld [vmem:[%s485_s2] ss:$0 sm:$0xff]  ;;  %v380_v23 = vmov 920167782   ;;  %v381_v27 = vmov 1326507024  }
  0x29   :  { %v382_v29 = vmov 683565275   ;;  %v383_v31 = vmov 2475754826   ;;  %v384_v34 = vmov 2131351028  }
  0x2a   :  { %276 = vmatpush3.bf16.msra.mxu0 %v275_v4  ;;  %s248_s17 = sshll.u32 %s386_s16, 4  ;;  %s249_s17 = int_to_ptr.vmem [resolvable:$true] %s248_s17 }
  0x2b   :  { %p349_p3 = scmp.lt.s32.totalorder %s249_s17, %s249_s17 }
  0x2d   :  { %272 = vmatmul.mubr.msk.f32.vlgmr.msra.gmra.mrb[0].mxu0 %vm55_vm1, %v44_v5 }
 0x100   :  { %v125_v7 = vpop.f32.mrb[0].mxu0 }
 0x101   :  { %v446_v8 = vadd.f32 %v258_v6, %v125_v7  ;;  %v273_v9 = vpop.f32.mrb[1].mxu0 }
 0x103   :  { %v132_v10 = vand.u32 2139095040, %v446_v8  ;;  %v129_v11 = vand.u32 2147483647, %v446_v8  ;;  %vm131_vm9 = vcmp.lt.s32.totalorder %v446_v8, 0  ;;  %vm221_vm0 = vweird.f32 %v446_v8 }
 0x105   :  { %v133_v12 = vshrl.u32 %v132_v10, 23  ;;  %v136_v14 = vand.u32 8388607, %v129_v11  ;;  %vm130_vm10 = vcmp.le.f32.partialorder %v129_v11, 0.7853982 }
 0x107   :  { %v260_v13 = vadd.s32 4294967169, %v133_v12  ;;  %v137_v17 = vor.u32 8388608, %v136_v14 }
 0x109   :  { %v139_v15 = vadd.s32 1, %v260_v13  ;;  %v177_v25 = vshll.u32 %v137_v17, 8 }
 0x10b   :  { %vm140_vm2 = vcmp.gt.s32.totalorder %v139_v15, 0 }
 0x10c   :  { %v141_v16 = vsel %vm140_vm2, %v139_v15, 0 }
 0x10d   :  { %v143_v18 = vand.u32 31, %v141_v16  ;;  %v142_v19 = vshrl.u32 %v141_v16, 5 }
 0x10f   :  { %v144_v20 = vsub.s32 32, %v143_v18  ;;  %v155_v22 = vshll.u32 %v379_v21, %v143_v18  ;;  %v158_v24 = vshll.u32 %v380_v23, %v143_v18  ;;  %v146_v30 = vshll.u32 %v382_v29, %v143_v18 }
 0x110   :  { %v149_v33 = vshll.u32 %v383_v31, %v143_v18  ;;  %v152_v36 = vshll.u32 %v384_v34, %v143_v18  ;;  %vm164_vm3 = vcmp.lt.s32.totalorder %v142_v19, 4  ;;  %vm161_vm4 = vcmp.lt.s32.totalorder %v142_v19, 1 }
 0x111   :  { %v156_v26 = vshrl.u32 %v380_v23, %v144_v20  ;;  %v159_v28 = vshrl.u32 %v381_v27, %v144_v20  ;;  %v147_v32 = vshrl.u32 %v383_v31, %v144_v20  ;;  %v150_v35 = vshrl.u32 %v384_v34, %v144_v20 }
 0x112   :  { %v153_v37 = vshrl.u32 %v379_v21, %v144_v20  ;;  %v145_v41 = vshrl.u32 %v382_v29, %v144_v20  ;;  %vm162_vm5 = vcmp.lt.s32.totalorder %v142_v19, 2  ;;  %vm163_vm6 = vcmp.lt.s32.totalorder %v142_v19, 3  ;;  %v48_v29 = vld [vmem:[%s486_s3] sm:$0x1]  ;;  %s344_s3 = scalar_lea.vmem %s249_s17, 128 }
 0x113   :  { %v157_v38 = vor.u32 %v156_v26, %v155_v22  ;;  %v160_v39 = vor.u32 %v159_v28, %v158_v24  ;;  %v148_v40 = vor.u32 %v147_v32, %v146_v30  ;;  %v151_v42 = vor.u32 %v150_v35, %v149_v33  ;;  %p345_p2 = scmp.ne.s32.totalorder %s249_s17, %s344_s3  ;;  %p350_p4 = scmp.lt.s32.totalorder %s344_s3, %s344_s3 }
 0x114   :  { %v154_v43 = vor.u32 %v153_v37, %v152_v36  ;;  %v235_v27 = vlaneseq  ;;  %vm233_vm11 = vcmp.gt.f32.partialorder %v48_v29, 0.5  ;;  %v385_v34 = vmov 0  }
 0x115   :  { %v170_v44 = vsel %vm164_vm3, %v157_v38, 920167782  ;;  %v174_v45 = vsel %vm164_vm3, %v160_v39, 1326507024  ;;  %v169_v47 = vsel %vm161_vm4, %v148_v40, %v151_v42  ;;  %v165_v50 = vsel %vm161_vm4, %v145_v41, %v148_v40  ;;  %p351_p5 = por %p350_p4, %p349_p3 }
 0x116   :  { %v166_v46 = vsel %vm164_vm3, %v154_v43, 2102212464  ;;  %v171_v48 = vsel %vm163_vm6, %v154_v43, %v170_v44  ;;  %v173_v49 = vsel %vm161_vm4, %v151_v42, %v154_v43  ;;  %v175_v53 = vsel %vm163_vm6, %v157_v38, %v174_v45 }
 0x117   :  { %v167_v51 = vsel %vm163_vm6, %v151_v42, %v166_v46  ;;  %v172_v52 = vsel %vm162_vm5, %v169_v47, %v171_v48  ;;  %v176_v54 = vsel %vm162_vm5, %v173_v49, %v175_v53  ;;  %v236_v31 = vshrl.u32 %v235_v27, 7  ;;  %p352_p6 = pnand %p351_p5, %p345_p2 }
 0x118   :  { %v452_v55 = vmul.u32.u64.low %v177_v25, %v172_v52  ;;  %v453_v56 = vmul.u32.u64.high %v177_v25, %v172_v52, %v452_v55  ;;  %v455_v57 = vmul.u32.u64.low %v177_v25, %v176_v54  ;;  %v456_v58 = vmul.u32.u64.high %v177_v25, %v176_v54, %v455_v57 }
 0x119   :  { %v168_v59 = vsel %vm162_vm5, %v165_v50, %v167_v51  ;;  %v237_v33 = vsub.s32 0, %v236_v31  ;;  %v234_v35 = vsel %vm233_vm11, 1, %v385_v34 }
 0x11a   :  { %v187_v60 = vadd.s32 1, %v453_v56  ;;  %v184_v61 = vmul.u32 %v177_v25, %v168_v59  ;;  %vm186_vm7 = vc.u32 %v456_v58, %v452_v55  ;;  %v185_v10 = vadd.s32 %v452_v55, %v456_v58 }
 0x11b   :  { %v238_v37 = vrot.slane %v234_v35, %v237_v33 }
 0x11c   :  { %v188_v62 = vsel %vm186_vm7, %v187_v60, %v453_v56 }
 0x11d   :  { %v189_v63 = vadd.s32 %v188_v62, %v184_v61  ;;  %vm239_vm15 = vcmp.eq.s32.totalorder %v238_v37, 1 }
 0x11f   :  { %v190_v0 = vadd.s32 536870912, %v189_v63 }
 0x121   :  { %v191_v1 = vshrl.u32 %v190_v0, 30 }
 0x123   :  { %v192_v2 = vshll.u32 %v191_v1, 30  ;;  %v215_v23 = vsub.s32 4, %v191_v1 }
 0x125   :  { %v193_v3 = vsub.s32 %v189_v63, %v192_v2  ;;  %v216_v26 = vsel %vm131_vm9, %v215_v23, %v191_v1 }
 0x126   :  { %v218_v30 = vsel %vm130_vm10, 0, %v216_v26 }
 0x127   :  { %v195_v4 = vsub.s32 0, %v193_v3  ;;  %v222_v32 = vadd.s32 3, %v218_v30 }
 0x129   :  { %v261_v5 = vmin.u32 %v195_v4, %v193_v3  ;;  %v223_v36 = vand.u32 3, %v222_v32 }
 0x12b   :  { %v197_v6 = vclz %v261_v5  ;;  %vm228_vm12 = vcmp.eq.s32.totalorder %v223_v36, 2  ;;  %vm225_vm13 = vcmp.eq.s32.totalorder %v223_v36, 0  ;;  %vm224_vm14 = vcmp.lt.s32.totalorder %v223_v36, 2 }
 0x12d   :  { %v262_v7 = vadd.s32 4294967294, %v197_v6 }
 0x12f   :  { %vm263_vm8 = vcmp.lt.s32.totalorder %v262_v7, 0 }
 0x130   :  { %v200_v9 = vsel %vm263_vm8, 0, %v262_v7 }
 0x131   :  { %v201_v12 = vsub.s32 32, %v200_v9  ;;  %v205_v13 = vsub.s32 4294967266, %v200_v9  ;;  %v202_v14 = vshll.u32 %v193_v3, %v200_v9 }
 0x133   :  { %v203_v15 = vshrl.u32 %v185_v10, %v201_v12  ;;  %v206_v16 = vadd.s32 127, %v205_v13 }
 0x135   :  { %v204_v17 = vor.u32 %v203_v15, %v202_v14  ;;  %v207_v18 = vshll.u32 %v206_v16, 23 }
 0x137   :  { %v208_v19 = vor.u32 4788187, %v207_v18  ;;  %v211_v21 = vcvt.s32.f32 %v204_v17 }
 0x139   :  { %v209_v20 = vand.u32 2147483647, %v208_v19 }
 0x13b   :  { %v212_v22 = vmul.f32 %v211_v21, %v209_v20 }
 0x13d   :  { %v213_v24 = vxor.u32 2147483648, %v212_v22 }
 0x13f   :  { %v214_v25 = vsel %vm131_vm9, %v213_v24, %v212_v22 }
 0x140   :  { %v217_v28 = vsel %vm130_vm10, %v446_v8, %v214_v25 }
 0x141   :  { %296 = vcosq.f32 %v217_v28 }
 0x142   :  { %298 = vsinq.f32 %v217_v28 }
 0x14b   :  { %v297_v11 = vpop.eup %296 }
 0x14c   :  { %v299_v38 = vpop.eup %298  ;;  %v229_v39 = vxor.u32 2147483648, %v297_v11 }
 0x14d   :  { %v226_v40 = vxor.u32 2147483648, %v299_v38 }
 0x14e   :  { %v230_v41 = vsel %vm228_vm12, %v229_v39, %v299_v38 }
 0x14f   :  { %v227_v42 = vsel %vm225_vm13, %v297_v11, %v226_v40 }
 0x150   :  { %v231_v43 = vsel %vm224_vm14, %v227_v42, %v230_v41 }
 0x151   :  { %v232_v44 = vsel %vm221_vm0, nan, %v231_v43 }
 0x152   :  { %v240_v45 = vsel %vm239_vm15, %v232_v44, %v446_v8 }
 0x153   :  { %241 = vst [vmem:[#allocation7] sm:$0xff] %v240_v45 }
 0x154   :  { %355 = shalt.err (!%p352_p6)
}
 0x155   :  { %s356_s20 = scalar_lea.hbm %s487_s4, 128 }
 0x156   :  { %p357_p7 = scmp.ne.s32.totalorder %s487_s4, %s356_s20  ;;  %p360_p8 = scmp.lt.u32.totalorder %s356_s20, %s487_s4 }
 0x158   :  { %p362_p9 = pnand %p360_p8, %p357_p7 }
 0x15a   :  { %365 = shalt.err (!%p362_p9)
}
 0x15b   :  { %251 = dma.vmem_to_hbm [thread:$0]  %s249_s17, 128, %s487_s4, [#allocation4]  }
 0x15c   :  { %370 = dma.done.wait [#allocation4], 128  }
 0x15d   :  { %371 = vsyncadd [#allocation4], 4294967168 }
 0x15e   :  { %255 = vsyncpa [#allocation3], 1 }
 0x15f   :  { %256 = vsyncpa [#allocation6], 1 }
 0x160   :  { %257 = vsyncpa [#allocation4], 1 }

</bundles_post_ra>
